<compile_context>
chip_gen: v7x
topology: tpu7x:2x2x1
jax: 0.10.0
libtpu: 0.0.40
codegen_flags: <defaults>
</compile_context>

<pallas_src>
import jax
import jax.numpy as jnp
from jax.experimental import pallas as pl
from jax.experimental.pallas import tpu as pltpu


def _leaky_relu(x, negative_slope=0.01):
    # Single VALU max per vreg instead of compare+select.
    return jnp.maximum(x, negative_slope * x)


def _round_up(n, m):
    return ((n + m - 1) // m) * m


# --------------------------------------------------------------------------
# Kernel: one batch tile through all three layers, weights VMEM-resident.
# --------------------------------------------------------------------------
def qnet_kernel(x_ref, w1_ref, b1_ref, w2_ref, b2_ref, w3_ref, b3_ref, o_ref):
    cd = w1_ref.dtype                       # compute dtype (bf16) for the MXU
    x = x_ref[...].astype(cd)               # cast on-chip; x arrives un-padded

    h1 = jnp.dot(x, w1_ref[...], preferred_element_type=jnp.float32) + b1_ref[...]
    h1 = _leaky_relu(h1).astype(cd)

    h2 = jnp.dot(h1, w2_ref[...], preferred_element_type=jnp.float32) + b2_ref[...]
    h2 = _leaky_relu(h2).astype(cd)

    out = jnp.dot(h2, w3_ref[...], preferred_element_type=jnp.float32) + b3_ref[...]
    o_ref[...] = out.astype(o_ref.dtype)    # narrow (tb, action_size) store


# --------------------------------------------------------------------------
# One-time parameter preparation (OUT of the per-call hot path).
# --------------------------------------------------------------------------
def prepare_qnet_params(params, *, compute_dtype=jnp.bfloat16):
    """Pads hidden to a multiple of 128 (no-op for hidden=128), casts weights to
    the MXU compute dtype, and reshapes biases to 2-D (1, N) f32.  Do this once
    per parameter update, not per forward call."""
    w1, b1, w2, b2, w3, b3 = params            # w: (in, out), b: (out,)
    status_size, hidden = w1.shape
    action_size = w3.shape[1]
    h_pad = _round_up(hidden, 128)
    cd = compute_dtype

    w1_p = jnp.zeros((status_size, h_pad), cd).at[:, :hidden].set(w1.astype(cd))
    w2_p = jnp.zeros((h_pad, h_pad), cd).at[:hidden, :hidden].set(w2.astype(cd))
    w3_p = jnp.zeros((h_pad, action_size), cd).at[:hidden, :].set(w3.astype(cd))
    b1_p = jnp.zeros((1, h_pad), jnp.float32).at[0, :hidden].set(b1.astype(jnp.float32))
    b2_p = jnp.zeros((1, h_pad), jnp.float32).at[0, :hidden].set(b2.astype(jnp.float32))
    b3_p = b3.astype(jnp.float32).reshape(1, action_size)
    return (w1_p, b1_p, w2_p, b2_p, w3_p, b3_p)


# --------------------------------------------------------------------------
# Forward wrapper: batch-tiled pallas_call, no per-call data copies.
# --------------------------------------------------------------------------
def qnet_forward(x, prepared_params, *, block_batch=4096, out_dtype=jnp.float32):
    w1_p, b1_p, w2_p, b2_p, w3_p, b3_p = prepared_params
    batch, status_size = x.shape
    assert w1_p.shape[0] == status_size, (w1_p.shape, status_size)
    h_pad = w1_p.shape[1]
    action_size = w3_p.shape[1]

    # ---- batch tile selection --------------------------------------------
    tb = min(block_batch, _round_up(batch, 8))
    # v7x megacore: make sure the "parallel" batch axis has >= 2 grid steps
    # whenever the batch allows it (no-op on single-TC v5e/v6e).
    if batch > 8 and pl.cdiv(batch, tb) < 2:
        tb = _round_up(pl.cdiv(batch, 2), 8)
    grid = (pl.cdiv(batch, tb),)    # ragged last block; no batch padding copy

    # ---- VMEM budget: only raise the scoped limit if we actually need it --
    def _isz(d):
        return jnp.dtype(d).itemsize

    est_vmem = (2 * tb * status_size * _isz(x.dtype)        # double-buffered x
                + 2 * tb * action_size * _isz(out_dtype)    # double-buffered out
                + 3 * tb * h_pad * 4                        # f32 h1/h2/out temporaries
                + sum(int(p.size) * _isz(p.dtype) for p in prepared_params))
    vmem_limit = None
    if est_vmem > 30 * 1024 * 1024:
        # v7x: 64 MiB physical / 32 MiB scoped default; v5e/v6e: 128 MiB physical.
        vmem_limit = min(int(est_vmem * 3 // 2), 60 * 1024 * 1024)

    # ---- specs -------------------------------------------------------------
    x_spec = pl.BlockSpec((tb, status_size), lambda i: (i, 0))      # last dim = full dim
    out_spec = pl.BlockSpec((tb, action_size), lambda i: (i, 0))    # narrow masked store

    def resident(a):
        # Same block every grid step -> stays in VMEM, no re-fetch across steps.
        return pl.BlockSpec(a.shape, lambda i: tuple(0 for _ in a.shape))

    out = pl.pallas_call(
        qnet_kernel,
        out_shape=jax.ShapeDtypeStruct((batch, action_size), out_dtype),
        grid=grid,
        in_specs=[x_spec,
                  resident(w1_p), resident(b1_p),
                  resident(w2_p), resident(b2_p),
                  resident(w3_p), resident(b3_p)],
        out_specs=out_spec,
        compiler_params=pltpu.CompilerParams(
            dimension_semantics=("parallel",),
            vmem_limit_bytes=vmem_limit,
        ),
    )(x, w1_p, b1_p, w2_p, b2_p, w3_p, b3_p)
    return out


# --------------------------------------------------------------------------
# Init mirroring the PyTorch module.
# --------------------------------------------------------------------------
def init_qnet_params(key, status_size, action_size, hidden_size=128):
    """Mirrors QNet:
    - weights: nn.init.kaiming_uniform_ (a=0, fan_in, leaky_relu)
      -> bound = sqrt(2) * sqrt(3/fan_in) = sqrt(6/fan_in)
    - biases: nn.Linear default uniform(-1/sqrt(fan_in), 1/sqrt(fan_in))
    Weights returned pre-transposed to (in, out)."""
    ks = jax.random.split(key, 6)

    def kaiming_uniform_T(k, fan_in, fan_out):
        bound = float(jnp.sqrt(6.0 / fan_in))
        w = jax.random.uniform(k, (fan_out, fan_in), jnp.float32, -bound, bound)
        return w.T  # (in, out)

    def bias_init(k, fan_in, fan_out):
        bound = float(1.0 / jnp.sqrt(fan_in))
        return jax.random.uniform(k, (fan_out,), jnp.float32, -bound, bound)

    w1 = kaiming_uniform_T(ks[0], status_size, hidden_size)
    b1 = bias_init(ks[1], status_size, hidden_size)
    w2 = kaiming_uniform_T(ks[2], hidden_size, hidden_size)
    b2 = bias_init(ks[3], hidden_size, hidden_size)
    w3 = kaiming_uniform_T(ks[4], hidden_size, action_size)
    b3 = bias_init(ks[5], hidden_size, action_size)
    return (w1, b1, w2, b2, w3, b3)


def qnet_ref(x, params, compute_dtype=jnp.bfloat16):
    """Pure-JAX reference with matching numerics (bf16 matmul inputs,
    f32 accumulation, f32 bias/leaky_relu epilogue)."""
    w1, b1, w2, b2, w3, b3 = params
    cd = compute_dtype
    h1 = _leaky_relu(
        jnp.dot(x.astype(cd), w1.astype(cd), preferred_element_type=jnp.float32) + b1)
    h2 = _leaky_relu(
        jnp.dot(h1.astype(cd), w2.astype(cd), preferred_element_type=jnp.float32) + b2)
    return jnp.dot(h2.astype(cd), w3.astype(cd), preferred_element_type=jnp.float32) + b3


if __name__ == "__main__":
    status_size = 16
    action_size = 4
    hidden_size = 128   # module default
    batch = 8

    key = jax.random.PRNGKey(0)
    k_param, k_x = jax.random.split(key)

    params = init_qnet_params(k_param, status_size, action_size, hidden_size)
    prepared = prepare_qnet_params(params)     # one-time, out of the hot path
    prepared = jax.tree_util.tree_map(jax.block_until_ready, prepared)

    x = jax.random.normal(k_x, (batch, status_size), jnp.float32)

    out = qnet_forward(x, prepared)
    out = jax.block_until_ready(out)

    ref = qnet_ref(x, params)
    assert out.shape == (batch, action_size), out.shape
    assert jnp.allclose(out, ref, atol=1e-3, rtol=1e-3), "mismatch vs reference"

    print("KERNEL_OK")
</pallas_src>

<mosaic_0001>
module attributes {stable_mosaic.version = 11 : i64} {
  func.func @qnet_kernel(%arg0: i32, %arg1: memref<8x16xf32, #tpu.memory_space<vmem>>, %arg2: memref<16x128xbf16, #tpu.memory_space<vmem>>, %arg3: memref<1x128xf32, #tpu.memory_space<vmem>>, %arg4: memref<128x128xbf16, #tpu.memory_space<vmem>>, %arg5: memref<1x128xf32, #tpu.memory_space<vmem>>, %arg6: memref<128x4xbf16, #tpu.memory_space<vmem>>, %arg7: memref<1x4xf32, #tpu.memory_space<vmem>>, %arg8: memref<8x4xf32, #tpu.memory_space<vmem>>) attributes {dimension_semantics = [#tpu.dimension_semantics<parallel>], iteration_bounds = array<i64: 1>, scalar_prefetch = 0 : i64, scratch_operands = 0 : i64, tpu.core_type = #tpu.core_type<tc>, window_params = [{transform_indices = @transform_0, window_bounds = array<i64: 8, 16>}, {pipeline_mode = #tpu.pipeline_mode<synchronous>, transform_indices = @transform_1, window_bounds = array<i64: 16, 128>}, {pipeline_mode = #tpu.pipeline_mode<synchronous>, transform_indices = @transform_2, window_bounds = array<i64: 1, 128>}, {pipeline_mode = #tpu.pipeline_mode<synchronous>, transform_indices = @transform_3, window_bounds = array<i64: 128, 128>}, {pipeline_mode = #tpu.pipeline_mode<synchronous>, transform_indices = @transform_4, window_bounds = array<i64: 1, 128>}, {pipeline_mode = #tpu.pipeline_mode<synchronous>, transform_indices = @transform_5, window_bounds = array<i64: 128, 4>}, {pipeline_mode = #tpu.pipeline_mode<synchronous>, transform_indices = @transform_6, window_bounds = array<i64: 1, 4>}, {transform_indices = @transform_7, window_bounds = array<i64: 8, 4>}]} {
    %c0 = arith.constant 0 : index
    %c0_0 = arith.constant 0 : index
    %0 = vector.load %arg1[%c0, %c0_0] : memref<8x16xf32, #tpu.memory_space<vmem>>, vector<8x16xf32>
    %1 = arith.truncf %0 : vector<8x16xf32> to vector<8x16xbf16>
    %c0_1 = arith.constant 0 : index
    %c0_2 = arith.constant 0 : index
    %2 = vector.load %arg2[%c0_1, %c0_2] : memref<16x128xbf16, #tpu.memory_space<vmem>>, vector<16x128xbf16>
    %cst = arith.constant dense<0.000000e+00> : vector<8x128xf32>
    %3 = tpu.matmul %1, %2, %cst {dimension_numbers = #tpu.dot_dimension_numbers<[1], [0], [0], [1], [0, 0, 1, 1], [], []>} : vector<8x16xbf16>, vector<16x128xbf16>, vector<8x128xf32> -> vector<8x128xf32>
    %c0_3 = arith.constant 0 : index
    %c0_4 = arith.constant 0 : index
    %4 = vector.load %arg3[%c0_3, %c0_4] : memref<1x128xf32, #tpu.memory_space<vmem>>, vector<1x128xf32>
    %5 = vector.broadcast %4 : vector<1x128xf32> to vector<8x128xf32>
    %6 = arith.addf %3, %5 : vector<8x128xf32>
    %cst_5 = arith.constant 0.00999999977 : f32
    %7 = vector.broadcast %cst_5 : f32 to vector<8x128xf32>
    %8 = arith.mulf %7, %6 : vector<8x128xf32>
    %9 = arith.maximumf %6, %8 : vector<8x128xf32>
    %10 = arith.truncf %9 : vector<8x128xf32> to vector<8x128xbf16>
    %c0_6 = arith.constant 0 : index
    %c0_7 = arith.constant 0 : index
    %11 = vector.load %arg4[%c0_6, %c0_7] : memref<128x128xbf16, #tpu.memory_space<vmem>>, vector<128x128xbf16>
    %cst_8 = arith.constant dense<0.000000e+00> : vector<8x128xf32>
    %12 = tpu.matmul %10, %11, %cst_8 {dimension_numbers = #tpu.dot_dimension_numbers<[1], [0], [0], [1], [0, 0, 1, 1], [], []>} : vector<8x128xbf16>, vector<128x128xbf16>, vector<8x128xf32> -> vector<8x128xf32>
    %c0_9 = arith.constant 0 : index
    %c0_10 = arith.constant 0 : index
    %13 = vector.load %arg5[%c0_9, %c0_10] : memref<1x128xf32, #tpu.memory_space<vmem>>, vector<1x128xf32>
    %14 = vector.broadcast %13 : vector<1x128xf32> to vector<8x128xf32>
    %15 = arith.addf %12, %14 : vector<8x128xf32>
    %cst_11 = arith.constant 0.00999999977 : f32
    %16 = vector.broadcast %cst_11 : f32 to vector<8x128xf32>
    %17 = arith.mulf %16, %15 : vector<8x128xf32>
    %18 = arith.maximumf %15, %17 : vector<8x128xf32>
    %19 = arith.truncf %18 : vector<8x128xf32> to vector<8x128xbf16>
    %c0_12 = arith.constant 0 : index
    %c0_13 = arith.constant 0 : index
    %20 = vector.load %arg6[%c0_12, %c0_13] : memref<128x4xbf16, #tpu.memory_space<vmem>>, vector<128x4xbf16>
    %cst_14 = arith.constant dense<0.000000e+00> : vector<8x4xf32>
    %21 = tpu.matmul %19, %20, %cst_14 {dimension_numbers = #tpu.dot_dimension_numbers<[1], [0], [0], [1], [0, 0, 1, 1], [], []>} : vector<8x128xbf16>, vector<128x4xbf16>, vector<8x4xf32> -> vector<8x4xf32>
    %c0_15 = arith.constant 0 : index
    %c0_16 = arith.constant 0 : index
    %22 = vector.load %arg7[%c0_15, %c0_16] : memref<1x4xf32, #tpu.memory_space<vmem>>, vector<1x4xf32>
    %23 = vector.broadcast %22 : vector<1x4xf32> to vector<8x4xf32>
    %24 = arith.addf %21, %23 : vector<8x4xf32>
    %c0_17 = arith.constant 0 : index
    %c0_18 = arith.constant 0 : index
    %25 = vector.load %arg8[%c0_17, %c0_18] : memref<8x4xf32, #tpu.memory_space<vmem>>, vector<8x4xf32>
    tpu.vector_store %arg8[%c0_17, %c0_18], %24 {strides = array<i32>} : memref<8x4xf32, #tpu.memory_space<vmem>>, vector<8x4xf32>,
    return
  }
  func.func @transform_0(%arg0: i32) -> (i32, i32) {
    %c0_i32 = arith.constant 0 : i32
    %c0_i32_0 = arith.constant 0 : i32
    return %arg0, %c0_i32 : i32, i32
  }
  func.func @transform_1(%arg0: i32) -> (i32, i32) {
    %c0_i32 = arith.constant 0 : i32
    %c0_i32_0 = arith.constant 0 : i32
    %c0_i32_1 = arith.constant 0 : i32
    return %c0_i32, %c0_i32_0 : i32, i32
  }
  func.func @transform_2(%arg0: i32) -> (i32, i32) {
    %c0_i32 = arith.constant 0 : i32
    %c0_i32_0 = arith.constant 0 : i32
    %c0_i32_1 = arith.constant 0 : i32
    return %c0_i32, %c0_i32_0 : i32, i32
  }
  func.func @transform_3(%arg0: i32) -> (i32, i32) {
    %c0_i32 = arith.constant 0 : i32
    %c0_i32_0 = arith.constant 0 : i32
    %c0_i32_1 = arith.constant 0 : i32
    return %c0_i32, %c0_i32_0 : i32, i32
  }
  func.func @transform_4(%arg0: i32) -> (i32, i32) {
    %c0_i32 = arith.constant 0 : i32
    %c0_i32_0 = arith.constant 0 : i32
    %c0_i32_1 = arith.constant 0 : i32
    return %c0_i32, %c0_i32_0 : i32, i32
  }
  func.func @transform_5(%arg0: i32) -> (i32, i32) {
    %c0_i32 = arith.constant 0 : i32
    %c0_i32_0 = arith.constant 0 : i32
    %c0_i32_1 = arith.constant 0 : i32
    return %c0_i32, %c0_i32_0 : i32, i32
  }
  func.func @transform_6(%arg0: i32) -> (i32, i32) {
    %c0_i32 = arith.constant 0 : i32
    %c0_i32_0 = arith.constant 0 : i32
    %c0_i32_1 = arith.constant 0 : i32
    return %c0_i32, %c0_i32_0 : i32, i32
  }
  func.func @transform_7(%arg0: i32) -> (i32, i32) {
    %c0_i32 = arith.constant 0 : i32
    %c0_i32_0 = arith.constant 0 : i32
    return %arg0, %c0_i32 : i32, i32
  }
}

</mosaic_0001>

<bundles_post_ra>
// kernel: tpu_custom_call.1
= control target key start
LH: loop header
LB: loop body
LE: loop exit
PB: predicated region body
PF: predicated region fallthrough
CT: control target
= control target key end

     0   :  { %12 = vsyncpa [#allocation3], 0  ;;  %s470_s24 = smov [#allocation2]   ;;  %s610_s0 = inlined_call_operand.vmem [shape: f32[8,16], index: 0, kind: input, shape index: {}]   ;;  %s611_s1 = inlined_call_operand.hbm [shape: bf16[16,128], index: 1, kind: input, shape index: {}]   ;;  %s612_s2 = inlined_call_operand.vmem [shape: f32[1,128], index: 2, kind: input, shape index: {}]   ;;  %s613_s3 = inlined_call_operand.vmem [shape: bf16[128,128], index: 3, kind: input, shape index: {}]   ;;  %s614_s4 = inlined_call_operand.vmem [shape: f32[1,128], index: 4, kind: input, shape index: {}]   ;;  %s615_s5 = inlined_call_operand.vmem [shape: bf16[128,4], index: 5, kind: input, shape index: {}]   ;;  %s616_s6 = inlined_call_operand.vmem [shape: f32[1,4], index: 6, kind: input, shape index: {}]   ;;  %s617_s7 = inlined_call_operand.vmem [shape: f32[8,4], index: 7, kind: output, shape index: {}]  }
   0x1   :  { %s20_s25 = sshll.u32 %s470_s24, 4  ;;  %s446_s28 = scalar_lea.hbm %s611_s1, 128  ;;  %s21_s25 = int_to_ptr.vmem [resolvable:$true] %s20_s25 }
   0x2   :  { %p447_p0 = scmp.ne.s32.totalorder %s611_s1, %s446_s28  ;;  %p450_p1 = scmp.lt.u32.totalorder %s446_s28, %s611_s1 }
   0x4   :  { %p452_p2 = pnand %p450_p1, %p447_p0 }
   0x6   :  { %455 = shalt.err (!%p452_p2)
}
   0x7   :  { %s456_s10 = scalar_lea.vmem %s21_s25, 128  ;;  %p461_p4 = scmp.lt.s32.totalorder %s21_s25, %s21_s25 }
   0x8   :  { %p457_p3 = scmp.ne.s32.totalorder %s21_s25, %s456_s10  ;;  %p462_p5 = scmp.lt.s32.totalorder %s456_s10, %s456_s10 }
   0xa   :  { %p463_p6 = por %p462_p5, %p461_p4 }
   0xc   :  { %p464_p7 = pnand %p463_p6, %p457_p3 }
   0xe   :  { %467 = shalt.err (!%p464_p7)
}
   0xf   :  { %s471_s11 = smov 64   ;;  %s472_s12 = smov 4  }
  0x10   :  { %26 = dma.hbm_to_vmem [thread:$0]  %s611_s1, 128, %s21_s25, [#allocation3], %s471_s11, %s471_s11, %s472_s12  }
  0x11   :  { %468 = dma.done.wait [#allocation3], 128  }
  0x12   :  { %469 = vsyncadd [#allocation3], 4294967168  ;;  %v473_v0 = vmov 0.0   ;;  %vm474_vm0 = vmmov 0   ;;  %v429_v1 = vld [vmem:[#allocation2] sm:$0xff]   ;;  %vm58_vm1 = vcmask 130048  }
  0x13   :  { %378 = vmatprep.subr.bf16.mxu0 %v473_v0  ;;  %380 = vmatprep.mubr.msk.bf16.mxu0 %vm474_vm0, %v473_v0  ;;  %v41_v2 = vld [vmem:[%s610_s0] sm:$0xff]  ;;  %v431_v5 = vld [vmem:[%s613_s3 + $0x8] sm:$0xff]   ;;  %v432_v6 = vld [vmem:[%s613_s3 + $0x10] sm:$0xff]   ;;  %vm330_vm2 = vcmask 31744  }
  0x14   :  { %384 = vmatprep.subr.bf16.mxu1 %v473_v0  ;;  %400 = vmatprep.mubr.msk.bf16.mxu1 %vm474_vm0, %v473_v0  ;;  %v42_v3 = vpack.c.bf16 %v41_v2, %v41_v2  ;;  %v430_v4 = vld [vmem:[%s613_s3] sm:$0xff]   ;;  %v433_v7 = vld [vmem:[%s613_s3 + $0x18] sm:$0xff]   ;;  %v435_v9 = vld [vmem:[%s613_s3 + $0x28] sm:$0xff]  }
  0x15   :  { %379 = vmatpush3.bf16.msra.mxu0 %v429_v1  ;;  %385 = vmatpush3.bf16.msra.mxu1 %v430_v4  ;;  %v434_v8 = vld [vmem:[%s613_s3 + $0x20] sm:$0xff]   ;;  %v436_v10 = vld [vmem:[%s613_s3 + $0x30] sm:$0xff]   ;;  %v437_v11 = vld [vmem:[%s613_s3 + $0x38] sm:$0xff]  }
  0x16   :  { %404 = vmatprep.subr.bf16.mxu0 %v473_v0  ;;  %386 = vmatprep.subr.bf16.mxu1 %v473_v0  ;;  %v438_v12 = vld [vmem:[%s615_s5] sm:$0xff]   ;;  %v439_v13 = vld [vmem:[%s615_s5 + $0x8] sm:$0xff]   ;;  %v440_v14 = vld [vmem:[%s615_s5 + $0x10] sm:$0xff]  }
  0x17   :  { %v441_v15 = vld [vmem:[%s615_s5 + $0x18] sm:$0xff]   ;;  %v442_v16 = vld [vmem:[%s615_s5 + $0x20] sm:$0xff]   ;;  %v443_v17 = vld [vmem:[%s615_s5 + $0x28] sm:$0xff]  }
  0x18   :  { %381 = vmatmul.mubr.msk.bf16.vlgmr.msra.gmra.mrb[0].mxu0 %vm58_vm1, %v42_v3  ;;  %v337_v18 = vld [vmem:[%s612_s2] ss:$0 sm:$0xff]  ;;  %v444_v27 = vld [vmem:[%s615_s5 + $0x30] sm:$0xff]   ;;  %v445_v28 = vld [vmem:[%s615_s5 + $0x38] sm:$0xff]  }
  0x19   :  { %420 = vmatprep.mubr.msk.bf16.mxu0 %vm474_vm0, %v473_v0  ;;  %387 = vmatpush3.bf16.msra.mxu1 %v431_v5  ;;  %v340_v29 = vld [vmem:[%s614_s4] ss:$0 sm:$0xff] }
  0x1a   :  { %388 = vmatprep.subr.bf16.mxu1 %v473_v0  ;;  %405 = vmatpush3.bf16.msra.mxu0 %v438_v12  ;;  %v349_v38 = vld [vmem:[%s616_s6] ss:$0 sm:$0xff] }
  0x1b   :  { %406 = vmatprep.subr.bf16.mxu0 %v473_v0 }
  0x1d   :  { %389 = vmatpush3.bf16.msra.mxu1 %v432_v6 }
  0x1e   :  { %390 = vmatprep.subr.bf16.mxu1 %v473_v0  ;;  %407 = vmatpush3.bf16.msra.mxu0 %v439_v13 }
  0x1f   :  { %408 = vmatprep.subr.bf16.mxu0 %v473_v0 }
  0x21   :  { %391 = vmatpush3.bf16.msra.mxu1 %v433_v7 }
  0x22   :  { %392 = vmatprep.subr.bf16.mxu1 %v473_v0  ;;  %409 = vmatpush3.bf16.msra.mxu0 %v440_v14 }
  0x23   :  { %410 = vmatprep.subr.bf16.mxu0 %v473_v0 }
  0x25   :  { %393 = vmatpush3.bf16.msra.mxu1 %v434_v8 }
  0x26   :  { %394 = vmatprep.subr.bf16.mxu1 %v473_v0  ;;  %411 = vmatpush3.bf16.msra.mxu0 %v441_v15 }
  0x27   :  { %412 = vmatprep.subr.bf16.mxu0 %v473_v0 }
  0x29   :  { %395 = vmatpush3.bf16.msra.mxu1 %v435_v9 }
  0x2a   :  { %396 = vmatprep.subr.bf16.mxu1 %v473_v0  ;;  %413 = vmatpush3.bf16.msra.mxu0 %v442_v16 }
  0x2b   :  { %414 = vmatprep.subr.bf16.mxu0 %v473_v0 }
  0x2d   :  { %397 = vmatpush3.bf16.msra.mxu1 %v436_v10 }
  0x2e   :  { %398 = vmatprep.subr.bf16.mxu1 %v473_v0  ;;  %415 = vmatpush3.bf16.msra.mxu0 %v443_v17 }
  0x2f   :  { %416 = vmatprep.subr.bf16.mxu0 %v473_v0 }
  0x31   :  { %399 = vmatpush3.bf16.msra.mxu1 %v437_v11 }
  0x32   :  { %417 = vmatpush3.bf16.msra.mxu0 %v444_v27 }
  0x33   :  { %418 = vmatprep.subr.bf16.mxu0 %v473_v0 }
  0x36   :  { %419 = vmatpush3.bf16.msra.mxu0 %v445_v28 }
  0xeb   :  { %v96_v19 = vpop.f32.mrb[0].mxu0 }
  0xec   :  { %v97_v20 = vadd.f32 %v337_v18, %v96_v19  ;;  %v382_v21 = vpop.f32.mrb[1].mxu0 }
  0xed   :  { %v99_v22 = vpop.f32.mrb[2].mxu0 }
  0xee   :  { %v102_v23 = vmul.f32 0.01, %v97_v20  ;;  %v383_v24 = vpop.f32.mrb[3].mxu0 }
  0xf0   :  { %v103_v25 = vmax.f32 %v97_v20, %v102_v23 }
  0xf2   :  { %v104_v26 = vpack.c.bf16 %v103_v25, %v103_v25 }
  0xf4   :  { %401 = vmatmul.mubr.bf16.vlgmr.msra.gmra.mrb[0].mxu1 %v104_v26 }
 0x1c7   :  { %v210_v30 = vpop.f32.mrb[0].mxu1 }
 0x1c8   :  { %v211_v31 = vadd.f32 %v340_v29, %v210_v30  ;;  %v402_v32 = vpop.f32.mrb[1].mxu1 }
 0x1c9   :  { %v213_v33 = vpop.f32.mrb[2].mxu1 }
 0x1ca   :  { %v216_v34 = vmul.f32 0.01, %v211_v31  ;;  %v403_v35 = vpop.f32.mrb[3].mxu1 }
 0x1cc   :  { %v217_v36 = vmax.f32 %v211_v31, %v216_v34 }
 0x1ce   :  { %v218_v37 = vpack.c.bf16 %v217_v36, %v217_v36 }
 0x1d0   :  { %421 = vmatmul.mubr.bf16.vlgmr.msra.gmra.mrb[4].mxu0 %v218_v37 }
 0x2a3   :  { %v324_v39 = vpop.f32.mrb[4].mxu0 }
 0x2a4   :  { %v325_v40 = vadd.f32 %v349_v38, %v324_v39  ;;  %v422_v41 = vpop.f32.mrb[5].mxu0 }
 0x2a5   :  { %v327_v42 = vpop.f32.mrb[6].mxu0 }
 0x2a6   :  { %331 = vst.msk [vmem:[%s617_s7] sm:$0xff] %vm330_vm2, %v325_v40  ;;  %v423_v43 = vpop.f32.mrb[7].mxu0 }
 0x2a7   :  { %336 = vsyncpa [#allocation3], 1 }

</bundles_post_ra>
